<compile_context>
chip_gen: v5e
topology: v5e:2x2
jax: 0.10.0
libtpu: 0.0.40
codegen_flags: <defaults>
</compile_context>

<pallas_src>
import functools

import jax
import jax.numpy as jnp
import numpy as np
from jax.experimental import pallas as pl
from jax.experimental.pallas import tpu as pltpu


def _round_up(x, m):
    return ((x + m - 1) // m) * m


def _repn_kernel(boxes_all_ref, boxes_blk_ref, a_blk_ref, b_all_ref,
                 w1g_ref, w2_ref, b2_ref, rel_ref, *, block_rows, row_chunk):
    """Computes one (block_rows, n_pad) slab of the relation matrix."""
    n_pad = boxes_all_ref.shape[0]
    hdim = w1g_ref.shape[1]
    num_chunks = block_rows // row_chunk

    # Small grid-invariant parameters hoisted out of the chunk loop.
    boxes_all = boxes_all_ref[...]                       # (Np, 4)  all columns j
    w1g = w1g_ref[...]                                   # (4, H)
    w2 = w2_ref[...]                                     # (1, H)
    b2 = b2_ref[0, 0]                                    # SMEM scalar

    def chunk_body(ci, carry):
        r0 = pl.multiple_of(ci * row_chunk, row_chunk)   # local row offset

        a_rows = a_blk_ref[pl.ds(r0, row_chunk), :]      # (rc, H)
        box_rows = boxes_blk_ref[pl.ds(r0, row_chunk), :]  # (rc, 4)
        b_all = b_all_ref[...]                           # (Np, H), b1 folded in

        # Batched geometry term (opt #4): one K=4 MXU matmul per chunk instead
        # of one per row.  HIGHEST is essentially free at K=4 and keeps the
        # large box coordinates exact.
        geom = jnp.abs(box_rows[:, None, :] - boxes_all[None, :, :])  # (rc, Np, 4)
        g = jnp.dot(geom.reshape(row_chunk * n_pad, 4), w1g,
                    precision=jax.lax.Precision.HIGHEST,
                    preferred_element_type=jnp.float32)
        g = g.reshape(row_chunk, n_pad, hdim)            # (rc, Np, H)

        # fc1 + relu:  A[i] + (B[j] + b1) + G[i, j]
        hid = jnp.maximum(a_rows[:, None, :] + b_all[None, :, :] + g, 0.0)

        # fc2: multiply + reduce over H -> lane-dense (rc, Np) rows (opt #3).
        rows = jnp.sum(hid * w2[None, :, :], axis=-1) + b2   # (rc, Np)

        rel_ref[pl.ds(r0, row_chunk), :] = rows          # lane-dense row store
        return carry

    jax.lax.fori_loop(0, num_chunks, chunk_body, 0)


def repn_pallas(feats, boxes, params, block_rows=128, row_chunk=8):
    assert row_chunk % 8 == 0, "row_chunk must be sublane aligned"
    n, _ = feats.shape
    hdim = params["w1a"].shape[1]

    # Opt #1 / #6: separable fc1 projections computed exactly once, outside the
    # grid, at full f32 precision (matches the torch fp32 Linear).
    a_all = jnp.dot(feats, params["w1a"], precision=jax.lax.Precision.HIGHEST)
    b_all = (jnp.dot(feats, params["w1b"], precision=jax.lax.Precision.HIGHEST)
             + params["b1"])                              # fc1 bias folded in

    # Row tiling: block_rows rows of rel per grid step (clamped for small N),
    # processed in row_chunk-row chunks inside the kernel.
    block_rows = _round_up(
        max(row_chunk, min(block_rows, _round_up(n, row_chunk))), row_chunk)
    n_pad = _round_up(n, block_rows)
    if n_pad != n:
        pad = ((0, n_pad - n), (0, 0))
        a_all = jnp.pad(a_all, pad)
        b_all = jnp.pad(b_all, pad)
        boxes = jnp.pad(boxes, pad)

    kernel = functools.partial(_repn_kernel, block_rows=block_rows,
                               row_chunk=row_chunk)
    rel = pl.pallas_call(
        kernel,
        grid=(n_pad // block_rows,),
        out_shape=jax.ShapeDtypeStruct((n_pad, n_pad), jnp.float32),
        in_specs=[
            pl.BlockSpec((n_pad, 4), lambda i: (0, 0)),          # boxes, all j
            pl.BlockSpec((block_rows, 4), lambda i: (i, 0)),     # boxes, block i
            pl.BlockSpec((block_rows, hdim), lambda i: (i, 0)),  # A rows of block
            pl.BlockSpec((n_pad, hdim), lambda i: (0, 0)),       # B (+b1), all j
            pl.BlockSpec((4, hdim), lambda i: (0, 0)),           # w1g
            pl.BlockSpec((1, hdim), lambda i: (0, 0)),           # w2
            pl.BlockSpec((1, 1), lambda i: (0, 0),
                         memory_space=pltpu.MemorySpace.SMEM),   # b2 scalar
        ],
        out_specs=pl.BlockSpec((block_rows, n_pad), lambda i: (i, 0)),
        compiler_params=pltpu.CompilerParams(
            dimension_semantics=("parallel",),
            vmem_limit_bytes=32 * 1024 * 1024),
    )(boxes, boxes, a_all, b_all, params["w1g"], params["w2"], params["b2"])
    return rel[:n, :n]


# --------------------------------------------------------------------------
# Pure-JAX reference (mirrors the torch forward; dropout is identity in eval).
# --------------------------------------------------------------------------
def repn_ref(feats, boxes, params):
    n, c = feats.shape
    f1 = jnp.broadcast_to(feats[:, None, :], (n, n, c))
    f2 = jnp.broadcast_to(feats[None, :, :], (n, n, c))
    geom = jnp.abs(boxes[:, None, :] - boxes[None, :, :])
    x = jnp.concatenate([f1, f2, geom], axis=-1)          # (n, n, 2C+4)
    w1 = jnp.concatenate([params["w1a"], params["w1b"], params["w1g"]], axis=0)
    hid = jnp.maximum(
        jnp.einsum("ijk,kh->ijh", x, w1,
                   precision=jax.lax.Precision.HIGHEST) + params["b1"][0], 0.0)
    return (jnp.einsum("ijh,h->ij", hid, params["w2"][0],
                       precision=jax.lax.Precision.HIGHEST)
            + params["b2"][0, 0])


# --------------------------------------------------------------------------
# Deterministic parameter init (fc1: Linear(2C+4, H), fc2: Linear(H, 1)).
# --------------------------------------------------------------------------
def init_params(key, in_c, hidden_c):
    ks = jax.random.split(key, 6)

    def nrm(k, shape, scale=0.05):
        return scale * jax.random.normal(k, shape, jnp.float32)

    return {
        "w1a": nrm(ks[0], (in_c, hidden_c)),   # fc1 weight rows for feats[i]
        "w1b": nrm(ks[1], (in_c, hidden_c)),   # fc1 weight rows for feats[j]
        "w1g": nrm(ks[2], (4, hidden_c)),      # fc1 weight rows for |bi - bj|
        "b1":  nrm(ks[3], (1, hidden_c)),      # fc1 bias
        "w2":  nrm(ks[4], (1, hidden_c)),      # fc2 weight
        "b2":  nrm(ks[5], (1, 1)),             # fc2 bias (SMEM scalar)
    }


if __name__ == "__main__":
    N, C, HIDDEN = 16, 32, 128                 # proposals, feature dim, fc1 width

    key = jax.random.PRNGKey(0)
    k_feat, k_b0, k_b1, k_param = jax.random.split(key, 4)
    feats = jax.random.normal(k_feat, (N, C), jnp.float32)
    xy0 = jax.random.uniform(k_b0, (N, 2), jnp.float32, 0.0, 40.0)
    wh = jax.random.uniform(k_b1, (N, 2), jnp.float32, 4.0, 24.0)
    boxes = jnp.concatenate([xy0, xy0 + wh], axis=1)       # (N, 4) xyxy

    params = init_params(k_param, C, HIDDEN)

    rel = repn_pallas(feats, boxes, params)                 # (N, N)
    jax.block_until_ready(rel)

    rel_r = repn_ref(feats, boxes, params)
    np.testing.assert_allclose(np.asarray(rel), np.asarray(rel_r),
                               atol=2e-3, rtol=2e-3)

    print("KERNEL_OK")
</pallas_src>

<mosaic_0001>
module attributes {stable_mosaic.version = 11 : i64} {
  func.func @_repn_kernel(%arg0: i32, %arg1: memref<16x4xf32, #tpu.memory_space<vmem>>, %arg2: memref<16x4xf32, #tpu.memory_space<vmem>>, %arg3: memref<16x128xf32, #tpu.memory_space<vmem>>, %arg4: memref<16x128xf32, #tpu.memory_space<vmem>>, %arg5: memref<4x128xf32, #tpu.memory_space<vmem>>, %arg6: memref<1x128xf32, #tpu.memory_space<vmem>>, %arg7: memref<1x1xf32, #tpu.memory_space<smem>>, %arg8: memref<16x16xf32, #tpu.memory_space<vmem>>) attributes {dimension_semantics = [#tpu.dimension_semantics<parallel>], iteration_bounds = array<i64: 1>, scalar_prefetch = 0 : i64, scratch_operands = 0 : i64, tpu.core_type = #tpu.core_type<tc>, window_params = [{pipeline_mode = #tpu.pipeline_mode<synchronous>, transform_indices = @transform_0, window_bounds = array<i64: 16, 4>}, {transform_indices = @transform_1, window_bounds = array<i64: 16, 4>}, {transform_indices = @transform_2, window_bounds = array<i64: 16, 128>}, {pipeline_mode = #tpu.pipeline_mode<synchronous>, transform_indices = @transform_3, window_bounds = array<i64: 16, 128>}, {pipeline_mode = #tpu.pipeline_mode<synchronous>, transform_indices = @transform_4, window_bounds = array<i64: 4, 128>}, {pipeline_mode = #tpu.pipeline_mode<synchronous>, transform_indices = @transform_5, window_bounds = array<i64: 1, 128>}, {transform_indices = @transform_6, window_bounds = array<i64: 1, 1>}, {transform_indices = @transform_7, window_bounds = array<i64: 16, 16>}]} {
    %c0 = arith.constant 0 : index
    %c0_0 = arith.constant 0 : index
    %0 = vector.load %arg1[%c0, %c0_0] : memref<16x4xf32, #tpu.memory_space<vmem>>, vector<16x4xf32>
    %c0_1 = arith.constant 0 : index
    %c0_2 = arith.constant 0 : index
    %1 = vector.load %arg5[%c0_1, %c0_2] : memref<4x128xf32, #tpu.memory_space<vmem>>, vector<4x128xf32>
    %c0_3 = arith.constant 0 : index
    %c0_4 = arith.constant 0 : index
    %2 = vector.load %arg6[%c0_3, %c0_4] : memref<1x128xf32, #tpu.memory_space<vmem>>, vector<1x128xf32>
    %c0_5 = arith.constant 0 : index
    %c0_6 = arith.constant 0 : index
    %3 = memref.load %arg7[%c0_5, %c0_6] : memref<1x1xf32, #tpu.memory_space<smem>>
    %c0_i32 = arith.constant 0 : i32
    %c2_i32 = arith.constant 2 : i32
    %4 = arith.addi %c0_i32, %c2_i32 : i32
    %c1_i32 = arith.constant 1 : i32
    scf.for %arg9 = %c0_i32 to %4 step %c1_i32  : i32 {
      %c8_i32 = arith.constant 8 : i32
      %5 = arith.muli %arg9, %c8_i32 : i32
      %6 = tpu.assume_multiple %5, 8 : i32
      %7 = arith.index_cast %6 : i32 to index
      %c0_8 = arith.constant 0 : index
      %8 = vector.load %arg3[%7, %c0_8] : memref<16x128xf32, #tpu.memory_space<vmem>>, vector<8x128xf32>
      %9 = arith.index_cast %6 : i32 to index
      %c0_9 = arith.constant 0 : index
      %10 = vector.load %arg2[%9, %c0_9] : memref<16x4xf32, #tpu.memory_space<vmem>>, vector<8x4xf32>
      %c0_10 = arith.constant 0 : index
      %c0_11 = arith.constant 0 : index
      %11 = vector.load %arg4[%c0_10, %c0_11] : memref<16x128xf32, #tpu.memory_space<vmem>>, vector<16x128xf32>
      %12 = vector.shape_cast %10 : vector<8x4xf32> to vector<8x1x4xf32>
      %13 = vector.shape_cast %0 : vector<16x4xf32> to vector<1x16x4xf32>
      %14 = vector.broadcast %12 : vector<8x1x4xf32> to vector<8x16x4xf32>
      %15 = vector.broadcast %13 : vector<1x16x4xf32> to vector<8x16x4xf32>
      %16 = arith.subf %14, %15 : vector<8x16x4xf32>
      %17 = math.absf %16 : vector<8x16x4xf32>
      %18 = vector.shape_cast %17 : vector<8x16x4xf32> to vector<128x4xf32>
      %cst = arith.constant dense<0.000000e+00> : vector<128x128xf32>
      %19 = tpu.matmul %18, %1, %cst {dimension_numbers = #tpu.dot_dimension_numbers<[1], [0], [0], [1], [0, 0, 1, 1], [], []>, precision = #tpu.contract_precision<fp32>} : vector<128x4xf32>, vector<4x128xf32>, vector<128x128xf32> -> vector<128x128xf32>
      %20 = vector.shape_cast %19 : vector<128x128xf32> to vector<8x16x128xf32>
      %21 = vector.shape_cast %8 : vector<8x128xf32> to vector<8x1x128xf32>
      %22 = vector.shape_cast %11 : vector<16x128xf32> to vector<1x16x128xf32>
      %23 = vector.broadcast %21 : vector<8x1x128xf32> to vector<8x16x128xf32>
      %24 = vector.broadcast %22 : vector<1x16x128xf32> to vector<8x16x128xf32>
      %25 = arith.addf %23, %24 : vector<8x16x128xf32>
      %26 = arith.addf %25, %20 : vector<8x16x128xf32>
      %cst_12 = arith.constant 0.000000e+00 : f32
      %27 = vector.broadcast %cst_12 : f32 to vector<8x16x128xf32>
      %28 = arith.maximumf %26, %27 : vector<8x16x128xf32>
      %29 = vector.shape_cast %2 : vector<1x128xf32> to vector<1x1x128xf32>
      %30 = vector.broadcast %29 : vector<1x1x128xf32> to vector<8x16x128xf32>
      %31 = arith.mulf %28, %30 : vector<8x16x128xf32>
      %cst_13 = arith.constant dense<0.000000e+00> : vector<8x16xf32>
      %32 = vector.multi_reduction <add>, %31, %cst_13 [2] : vector<8x16x128xf32> to vector<8x16xf32>
      %33 = vector.broadcast %3 : f32 to vector<8x16xf32>
      %34 = arith.addf %32, %33 : vector<8x16xf32>
      %35 = arith.index_cast %6 : i32 to index
      %c0_14 = arith.constant 0 : index
      %36 = vector.load %arg8[%35, %c0_14] : memref<16x16xf32, #tpu.memory_space<vmem>>, vector<8x16xf32>
      tpu.vector_store %arg8[%35, %c0_14], %34 {strides = array<i32>} : memref<16x16xf32, #tpu.memory_space<vmem>>, vector<8x16xf32>,
    }
    %c2_i32_7 = arith.constant 2 : i32
    return
  }
  func.func @transform_0(%arg0: i32) -> (i32, i32) {
    %c0_i32 = arith.constant 0 : i32
    %c0_i32_0 = arith.constant 0 : i32
    %c0_i32_1 = arith.constant 0 : i32
    return %c0_i32, %c0_i32_0 : i32, i32
  }
  func.func @transform_1(%arg0: i32) -> (i32, i32) {
    %c0_i32 = arith.constant 0 : i32
    %c0_i32_0 = arith.constant 0 : i32
    return %arg0, %c0_i32 : i32, i32
  }
  func.func @transform_2(%arg0: i32) -> (i32, i32) {
    %c0_i32 = arith.constant 0 : i32
    %c0_i32_0 = arith.constant 0 : i32
    return %arg0, %c0_i32 : i32, i32
  }
  func.func @transform_3(%arg0: i32) -> (i32, i32) {
    %c0_i32 = arith.constant 0 : i32
    %c0_i32_0 = arith.constant 0 : i32
    %c0_i32_1 = arith.constant 0 : i32
    return %c0_i32, %c0_i32_0 : i32, i32
  }
  func.func @transform_4(%arg0: i32) -> (i32, i32) {
    %c0_i32 = arith.constant 0 : i32
    %c0_i32_0 = arith.constant 0 : i32
    %c0_i32_1 = arith.constant 0 : i32
    return %c0_i32, %c0_i32_0 : i32, i32
  }
  func.func @transform_5(%arg0: i32) -> (i32, i32) {
    %c0_i32 = arith.constant 0 : i32
    %c0_i32_0 = arith.constant 0 : i32
    %c0_i32_1 = arith.constant 0 : i32
    return %c0_i32, %c0_i32_0 : i32, i32
  }
  func.func @transform_6(%arg0: i32) -> (i32, i32) {
    %c0_i32 = arith.constant 0 : i32
    %c0_i32_0 = arith.constant 0 : i32
    %c0_i32_1 = arith.constant 0 : i32
    return %c0_i32, %c0_i32_0 : i32, i32
  }
  func.func @transform_7(%arg0: i32) -> (i32, i32) {
    %c0_i32 = arith.constant 0 : i32
    %c0_i32_0 = arith.constant 0 : i32
    return %arg0, %c0_i32 : i32, i32
  }
}

</mosaic_0001>

<bundles_post_ra>
// kernel: tpu_custom_call.1
= control target key start
LH: loop header
LB: loop body
LE: loop exit
PB: predicated region body
PF: predicated region fallthrough
CT: control target
= control target key end

     0   :  { %13 = vsyncpa [#allocation4], 0  ;;  %s1108_s9 = smov 0   ;;  %s1541_s0 = inlined_call_operand.vmem [shape: f32[16,4], index: 0, kind: input, shape index: {}]   ;;  %s1542_s1 = inlined_call_operand.vmem [shape: f32[16,4], index: 1, kind: input, shape index: {}]   ;;  %s1543_s2 = inlined_call_operand.vmem [shape: f32[16,128], index: 2, kind: input, shape index: {}]   ;;  %s1544_s3 = inlined_call_operand.vmem [shape: f32[16,128], index: 3, kind: input, shape index: {}]   ;;  %s1545_s4 = inlined_call_operand.vmem [shape: f32[4,128], index: 4, kind: input, shape index: {}]   ;;  %s1546_s5 = inlined_call_operand.vmem [shape: f32[1,128], index: 5, kind: input, shape index: {}]   ;;  %s1547_s6 = inlined_call_operand.<no memory space> [shape: f32[1,1], index: 6, kind: input, shape index: {}]   ;;  %s1548_s7 = inlined_call_operand.hbm [shape: f32[16,16], index: 7, kind: output, shape index: {}]  }
   0x1   :  { %v1091_v0 = vld [vmem:[%s1541_s0] sm:$0xff]  ;;  %v1096_v1 = vld [vmem:[%s1541_s0 + $0x8] sm:$0xff] }
   0x2   :  { %v1101_v2 = vld [vmem:[%s1545_s4] sm:$0xf] }
   0x3   :  { %v1106_v3 = vld [vmem:[%s1546_s5] sm:$0x1] }
   0x4 LB: > { %vm151_vm0 = vcmask 1043456   ;;  %s1115_s0 = sshll.u32 %s1043_s9, 3  ;;  %vm102_vm1 = vcmask 31744   ;;  %vm927_vm2 = vcmask 130112   ;;  %vm950_vm3 = vcmask 1041409   ;;  %s38_s9 = sadd.s32 1, %s1043_s9   ;;  %s1043_s9 = sphi %s1108_s9, %s38_s9  }
   0x5   : > { %v153_v4 = vsel %vm151_vm0, %v1101_v2, 0  ;;  %s42_s5 = scalar_lea.vmem %s1542_s1, %s1115_s0  ;;  %s40_s13 = scalar_lea.vmem %s1543_s2, %s1115_s0  ;;  %vm952_vm4 = vcmask 1042434   ;;  %vm954_vm5 = vcmask 1043459   ;;  %vm956_vm6 = vcmask 1044484  }
   0x6   : > { %v170_v5 = vand.u32 4294901760, %v153_v4  ;;  %v1121_v7 = vld [vmem:[%s42_s5] sm:$0xff]  ;;  %vm958_vm7 = vcmask 1045509   ;;  %vm960_vm8 = vcmask 1046534   ;;  %vm962_vm9 = vcmask 1047559   ;;  %s965_s20 = scalar_lea.vmem [#allocation3], %s1115_s0 }
   0x7   : > { %v50_v8 = vrot.slane %v1121_v7, 4  ;;  %v54_v9 = vperm.slane %v1121_v7, 0  ;;  %v51_v10 = vrot.slane %v1121_v7, 5  ;;  %v47_v11 = vrot.slane %v1121_v7, 1  ;;  %p35_p0 = scmp.ge.s32.totalorder %s38_s9, 2  }
   0x8   : > { %998 = vmatpush.msra.mxu2 %v170_v5  ;;  %v317_v6 = vsub.f32 %v153_v4, %v170_v5  ;;  %171 = vmatpush.msra.mxu0 %v170_v5  ;;  %v52_v46 = vrot.slane %v1121_v7, 6  ;;  %v48_v4 = vrot.slane %v1121_v7, 2  ;;  %vm966_vm10 = vcmask 130048   ;;  %s974_s23 = sshll.u32 (%p35_p0), %s1548_s7, 4  ;;  %s1045_s24 = smov (%p35_p0), [#allocation3]   ;;  %s975_s23 = int_to_ptr.hbm [resolvable:$true] %s974_s23 }
   0x9   : > { %v58_v13 = vperm.slane %v50_v8, 0  ;;  %v70_v14 = vsub.f32 %v54_v9, %v1091_v0  ;;  %v59_v15 = vperm.slane %v51_v10, 0  ;;  %v71_v16 = vsub.f32 %v54_v9, %v1096_v1  ;;  %s972_s25 = sshll.u32 (%p35_p0), %s1045_s24, 4  ;;  %s1046_s26 = smov (%p35_p0), 128   ;;  %s973_s25 = int_to_ptr.vmem [resolvable:$true] %s972_s25 }
   0xa   : > { %v318_v12 = vand.u32 4294901760, %v317_v6  ;;  %404 = vmatpush.msrb.mxu2 %v317_v6  ;;  %v55_v18 = vperm.slane %v47_v11, 0  ;;  %v60_v56 = vperm.slane %v52_v46, 0  ;;  %v56_v11 = vperm.slane %v48_v4, 0  ;;  %s1047_s27 = smov (%p35_p0), 8  }
   0xb   : > { %v78_v19 = vsub.f32 %v58_v13, %v1091_v0  ;;  %v79_v20 = vsub.f32 %v58_v13, %v1096_v1  ;;  %v86_v21 = vand.u32 2147483647, %v70_v14  ;;  %v80_v22 = vsub.f32 %v59_v15, %v1091_v0 }
   0xc   : > { %v319_v17 = vsub.f32 %v317_v6, %v318_v12  ;;  %618 = vmatpush.msrb.mxu0 %v318_v12  ;;  %v87_v24 = vand.u32 2147483647, %v71_v16  ;;  %v72_v25 = vsub.f32 %v55_v18, %v1091_v0  ;;  %v81_v45 = vsub.f32 %v59_v15, %v1096_v1 }
   0xd   : > { %v94_v26 = vand.u32 2147483647, %v78_v19  ;;  %v95_v27 = vand.u32 2147483647, %v79_v20  ;;  %v104_v28 = vsel %vm102_vm1, %v86_v21, 0  ;;  %v73_v60 = vsub.f32 %v55_v18, %v1096_v1 }
   0xe   : > { %v320_v23 = vand.u32 4294901760, %v319_v17  ;;  %v1134_v29 = vand.u32 4294901760, %v104_v28  ;;  %v96_v30 = vand.u32 2147483647, %v80_v22  ;;  %v107_v31 = vsel %vm102_vm1, %v87_v24, 0 }
   0xf   : > { %v128_v32 = vsel %vm102_vm1, %v94_v26, 0  ;;  %v131_v33 = vsel %vm102_vm1, %v95_v27, 0  ;;  %v1139_v34 = vand.u32 4294901760, %v107_v31  ;;  %v88_v35 = vand.u32 2147483647, %v72_v25 }
  0x10   : > { %999 = vmatpush.msra.mxu3 %v320_v23  ;;  %321 = vmatpush.msra.mxu1 %v320_v23  ;;  %v1141_v36 = vand.u32 4294901760, %v128_v32  ;;  %v1143_v37 = vand.u32 4294901760, %v131_v33  ;;  %v1146_v38 = vsub.f32 %v104_v28, %v1134_v29  ;;  %v134_v44 = vsel %vm102_vm1, %v96_v30, 0 }
  0x11   : > { %323 = vmatmul.f32.vlgmr.msra.gmra.mxu1 %v1134_v29  ;;  %v1150_v39 = vsub.f32 %v107_v31, %v1139_v34  ;;  %v110_v40 = vsel %vm102_vm1, %v88_v35, 0  ;;  %v1175_v54 = vand.u32 4294901760, %v134_v44  ;;  %v97_v55 = vand.u32 2147483647, %v81_v45 }
  0x12   : > { %502 = vmatpush.msrb.mxu3 %v170_v5  ;;  %700 = vmatpush.msrb.mxu1 %v170_v5  ;;  %v1154_v41 = vsub.f32 %v128_v32, %v1141_v36  ;;  %v1158_v42 = vsub.f32 %v131_v33, %v1143_v37  ;;  %v174_v43 = vand.u32 4294901760, %v1146_v38  ;;  %v1169_v50 = vand.u32 4294901760, %v110_v40 }
  0x13   : > { %355 = vmatmul.f32.vlgmr.msra.gmra.mxu3 %v1141_v36  ;;  %v182_v49 = vand.u32 4294901760, %v1150_v39  ;;  %v1190_v62 = vsub.f32 %v134_v44, %v1175_v54  ;;  %v89_v63 = vand.u32 2147483647, %v73_v60  ;;  %v137_v5 = vsel %vm102_vm1, %v97_v55, 0 }
  0x14   : > { %v238_v47 = vand.u32 4294901760, %v1154_v41  ;;  %v175_v48 = vsub.f32 %v1146_v38, %v174_v43  ;;  %v246_v52 = vand.u32 4294901760, %v1158_v42  ;;  %v1182_v59 = vsub.f32 %v110_v40, %v1169_v50 }
  0x15   : > { %v183_v58 = vsub.f32 %v1150_v39, %v182_v49  ;;  %v82_v6 = vsub.f32 %v60_v56, %v1091_v0  ;;  %v113_v10 = vsel %vm102_vm1, %v89_v63, 0  ;;  %v254_v14 = vand.u32 4294901760, %v1190_v62 }
  0x16   : > { %v239_v51 = vsub.f32 %v1154_v41, %v238_v47  ;;  %v176_v53 = vand.u32 4294901760, %v175_v48  ;;  %v247_v61 = vsub.f32 %v1158_v42, %v246_v52  ;;  %v190_v9 = vand.u32 4294901760, %v1182_v59 }
  0x17   : > { %v184_v8 = vand.u32 4294901760, %v183_v58  ;;  %v1197_v12 = vand.u32 4294901760, %v113_v10  ;;  %v1200_v15 = vand.u32 4294901760, %v137_v5  ;;  %v74_v16 = vsub.f32 %v56_v11, %v1091_v0 }
  0x18   : > { %v240_v57 = vand.u32 4294901760, %v239_v51  ;;  %177 = vmatmul.f32.vlgmr.msra.gmra.mxu0 %v176_v53  ;;  %v248_v13 = vand.u32 4294901760, %v247_v61  ;;  %v98_v17 = vand.u32 2147483647, %v82_v6  ;;  %v191_v18 = vsub.f32 %v1182_v59, %v190_v9 }
  0x19   : > { %327 = vmatmul.f32.gmra.mxu1 %v1139_v34  ;;  %v1208_v19 = vsub.f32 %v113_v10, %v1197_v12  ;;  %v90_v20 = vand.u32 2147483647, %v74_v16  ;;  %v75_v21 = vsub.f32 %v56_v11, %v1096_v1  ;;  %v49_v22 = vrot.slane %v1121_v7, 3 }
  0x1a   : > { %241 = vmatmul.f32.vlgmr.msra.gmra.mxu2 %v240_v57  ;;  %v255_v23 = vsub.f32 %v1190_v62, %v254_v14  ;;  %v1217_v24 = vsub.f32 %v137_v5, %v1200_v15  ;;  %v140_v26 = vsel %vm102_vm1, %v98_v17, 0  ;;  %v83_v27 = vsub.f32 %v60_v56, %v1096_v1 }
  0x1b   : > { %359 = vmatmul.f32.gmra.mxu3 %v1143_v37  ;;  %v116_v25 = vsel %vm102_vm1, %v90_v20, 0  ;;  %v53_v28 = vrot.slane %v1121_v7, 7  ;;  %v192_v30 = vand.u32 4294901760, %v191_v18  ;;  %v198_v31 = vand.u32 4294901760, %v1208_v19 }
  0x1c   : > { %v1224_v32 = vand.u32 4294901760, %v116_v25  ;;  %v91_v33 = vand.u32 2147483647, %v75_v21  ;;  %v57_v35 = vperm.slane %v49_v22, 0  ;;  %v256_v40 = vand.u32 4294901760, %v255_v23 }
  0x1d   : > { %v262_v44 = vand.u32 4294901760, %v1217_v24  ;;  %v1227_v45 = vand.u32 4294901760, %v140_v26  ;;  %v99_v46 = vand.u32 2147483647, %v83_v27  ;;  %v61_v48 = vperm.slane %v53_v28, 0 }
  0x1e   : > { %v199_v51 = vsub.f32 %v1208_v19, %v198_v31  ;;  %v1234_v7 = vsub.f32 %v116_v25, %v1224_v32  ;;  %v119_v53 = vsel %vm102_vm1, %v91_v33, 0  ;;  %v76_v55 = vsub.f32 %v57_v35, %v1091_v0 }
  0x1f   : > { %v263_v56 = vsub.f32 %v1217_v24, %v262_v44  ;;  %v1243_v57 = vsub.f32 %v140_v26, %v1227_v45  ;;  %v143_v58 = vsel %vm102_vm1, %v99_v46, 0  ;;  %v84_v60 = vsub.f32 %v61_v48, %v1091_v0 }
  0x20   : > { %185 = vmatmul.f32.gmra.mxu0 %v184_v8  ;;  %v200_v61 = vand.u32 4294901760, %v199_v51  ;;  %v206_v63 = vand.u32 4294901760, %v1234_v7  ;;  %v1248_v4 = vand.u32 4294901760, %v119_v53  ;;  %v92_v5 = vand.u32 2147483647, %v76_v55 }
  0x21   : > { %331 = vmatmul.f32.gmra.mxu1 %v1169_v50  ;;  %v264_v6 = vand.u32 4294901760, %v263_v56  ;;  %v270_v8 = vand.u32 4294901760, %v1243_v57  ;;  %v1251_v10 = vand.u32 4294901760, %v143_v58  ;;  %v100_v11 = vand.u32 2147483647, %v84_v60 }
  0x22   : > { %249 = vmatmul.f32.gmra.mxu2 %v248_v13  ;;  %v207_v13 = vsub.f32 %v1234_v7, %v206_v63  ;;  %v1258_v16 = vsub.f32 %v119_v53, %v1248_v4  ;;  %v122_v17 = vsel %vm102_vm1, %v92_v5, 0  ;;  %v77_v18 = vsub.f32 %v57_v35, %v1096_v1 }
  0x23   : > { %363 = vmatmul.f32.gmra.mxu3 %v1175_v54  ;;  %v271_v20 = vsub.f32 %v1243_v57, %v270_v8  ;;  %v1267_v21 = vsub.f32 %v143_v58, %v1251_v10  ;;  %v146_v22 = vsel %vm102_vm1, %v100_v11, 0  ;;  %v85_v23 = vsub.f32 %v61_v48, %v1096_v1 }
  0x24   : > { %v208_v25 = vand.u32 4294901760, %v207_v13  ;;  %v214_v26 = vand.u32 4294901760, %v1258_v16  ;;  %v1272_v27 = vand.u32 4294901760, %v122_v17  ;;  %v93_v28 = vand.u32 2147483647, %v77_v18 }
  0x25   : > { %v278_v33 = vand.u32 4294901760, %v1267_v21  ;;  %v1275_v35 = vand.u32 4294901760, %v146_v22 }
  0x26   : > { %v215_v46 = vsub.f32 %v1258_v16, %v214_v26  ;;  %v221_v48 = vsub.f32 %v122_v17, %v1272_v27  ;;  %v125_v51 = vsel %vm102_vm1, %v93_v28, 0 }
  0x27   : > { %v279_v53 = vsub.f32 %v1267_v21, %v278_v33  ;;  %v1288_v55 = vsub.f32 %v146_v22, %v1275_v35 }
  0x28   : > { %193 = vmatmul.f32.gmra.mxu0 %v192_v30  ;;  %v272_v30 = vand.u32 4294901760, %v271_v20  ;;  %v216_v58 = vand.u32 4294901760, %v215_v46  ;;  %v222_v60 = vand.u32 4294901760, %v221_v48 }
  0x29   : > { %335 = vmatmul.f32.gmra.mxu1 %v1197_v12  ;;  %v280_v5 = vand.u32 4294901760, %v279_v53 }
  0x2a   : > { %257 = vmatmul.f32.gmra.mxu2 %v256_v40  ;;  %v101_v40 = vand.u32 2147483647, %v85_v23  ;;  %v223_v13 = vsub.f32 %v221_v48, %v222_v60 }
  0x2b   : > { %367 = vmatmul.f32.gmra.mxu3 %v1200_v15 }
  0x2c   : > { %v149_v56 = vsel %vm102_vm1, %v101_v40, 0  ;;  %v224_v22 = vand.u32 4294901760, %v223_v13 }
  0x2d   : > { %v1292_v11 = vand.u32 4294901760, %v149_v56 }
  0x2f   : > { %v1300_v20 = vsub.f32 %v149_v56, %v1292_v11 }
  0x30   : > { %201 = vmatmul.f32.gmra.mxu0 %v200_v61  ;;  %v228_v61 = vand.u32 4294901760, %v125_v51 }
  0x31   : > { %339 = vmatmul.f32.gmra.mxu1 %v1224_v32  ;;  %v294_v28 = vand.u32 4294901760, %v1300_v20 }
  0x32   : > { %265 = vmatmul.f32.gmra.mxu2 %v264_v6  ;;  %v286_v6 = vand.u32 4294901760, %v1288_v55  ;;  %v229_v17 = vsub.f32 %v125_v51, %v228_v61 }
  0x33   : > { %371 = vmatmul.f32.gmra.mxu3 %v1227_v45  ;;  %v295_v40 = vsub.f32 %v1300_v20, %v294_v28 }
  0x34   : > { %v287_v18 = vsub.f32 %v1288_v55, %v286_v6  ;;  %v230_v23 = vand.u32 4294901760, %v229_v17 }
  0x35   : > { %v296_v51 = vand.u32 4294901760, %v295_v40 }
  0x38   : > { %209 = vmatmul.f32.gmra.mxu0 %v208_v25  ;;  %v288_v25 = vand.u32 4294901760, %v287_v18 }
  0x39   : > { %343 = vmatmul.f32.gmra.mxu1 %v1248_v4 }
  0x3a   : > { %273 = vmatmul.f32.gmra.mxu2 %v272_v30  ;;  %v231_v30 = vsub.f32 %v229_v17, %v230_v23 }
  0x3b   : > { %375 = vmatmul.f32.gmra.mxu3 %v1251_v10 }
  0x3c   : > { %v232_v46 = vand.u32 4294901760, %v231_v30 }
  0x40   : > { %217 = vmatmul.f32.gmra.mxu0 %v216_v58 }
  0x41   : > { %347 = vmatmul.f32.gmra.mxu1 %v1272_v27 }
  0x42   : > { %281 = vmatmul.f32.gmra.mxu2 %v280_v5 }
  0x43   : > { %379 = vmatmul.f32.gmra.mxu3 %v1275_v35 }
  0x48   : > { %225 = vmatmul.f32.gmra.mxu0 %v224_v22  ;;  %v1439_v22 = vld [vmem:[%s1544_s3] sm:$0xff] }
  0x49   : > { %351 = vmatmul.f32.gmra.mxu1 %v228_v61 }
  0x4a   : > { %289 = vmatmul.f32.gmra.mxu2 %v288_v25 }
  0x4b   : > { %383 = vmatmul.f32.gmra.mxu3 %v1292_v11 }
  0x50   : > { %233 = vmatmul.f32.gmra.mxu0 %v232_v46 }
  0x51   : > { %702 = vmatmul.f32.vlgmr.msrb.gmra.mxu1 %v1134_v29 }
  0x52   : > { %297 = vmatmul.f32.gmra.mxu2 %v296_v51 }
  0x53   : > { %506 = vmatmul.f32.vlgmr.msrb.gmra.mxu3 %v174_v43 }
  0x58   : > { %620 = vmatmul.f32.vlgmr.msrb.gmra.mxu0 %v1134_v29 }
  0x59   : > { %706 = vmatmul.f32.gmra.mxu1 %v1139_v34 }
  0x5a   : > { %407 = vmatmul.f32.vlgmr.msrb.gmra.mxu2 %v1146_v38 }
  0x5b   : > { %512 = vmatmul.f32.gmra.mxu3 %v182_v49 }
  0x60   : > { %624 = vmatmul.f32.gmra.mxu0 %v1139_v34 }
  0x61   : > { %710 = vmatmul.f32.gmra.mxu1 %v1169_v50 }
  0x62   : > { %412 = vmatmul.f32.gmra.mxu2 %v1150_v39 }
  0x63   : > { %518 = vmatmul.f32.gmra.mxu3 %v190_v9 }
  0x68   : > { %628 = vmatmul.f32.gmra.mxu0 %v1169_v50 }
  0x69   : > { %714 = vmatmul.f32.gmra.mxu1 %v1197_v12 }
  0x6a   : > { %417 = vmatmul.f32.gmra.mxu2 %v1182_v59 }
  0x6b   : > { %524 = vmatmul.f32.gmra.mxu3 %v198_v31 }
  0x70   : > { %632 = vmatmul.f32.gmra.mxu0 %v1197_v12 }
  0x71   : > { %718 = vmatmul.f32.gmra.mxu1 %v1224_v32 }
  0x72   : > { %422 = vmatmul.f32.gmra.mxu2 %v1208_v19 }
  0x73   : > { %530 = vmatmul.f32.gmra.mxu3 %v206_v63 }
  0x78   : > { %636 = vmatmul.f32.gmra.mxu0 %v1224_v32 }
  0x79   : > { %722 = vmatmul.f32.gmra.mxu1 %v1248_v4 }
  0x7a   : > { %427 = vmatmul.f32.gmra.mxu2 %v1234_v7 }
  0x7b   : > { %536 = vmatmul.f32.gmra.mxu3 %v214_v26 }
  0x80   : > { %640 = vmatmul.f32.gmra.mxu0 %v1248_v4 }
  0x81   : > { %726 = vmatmul.f32.gmra.mxu1 %v1272_v27 }
  0x82   : > { %432 = vmatmul.f32.gmra.mxu2 %v1258_v16 }
  0x83   : > { %542 = vmatmul.f32.gmra.mxu3 %v222_v60 }
  0x88   : > { %644 = vmatmul.f32.gmra.mxu0 %v1272_v27 }
  0x89   : > { %730 = vmatmul.f32.gmra.mxu1 %v228_v61 }
  0x8a   : > { %437 = vmatmul.f32.gmra.mxu2 %v221_v48 }
  0x8b   : > { %548 = vmatmul.f32.gmra.mxu3 %v230_v23 }
  0x8e   : > { %v1339_v29 = vpop.f32.mrf.mxu1 }
  0x90   : > { %648 = vmatmul.f32.gmra.mxu0 %v228_v61  ;;  %v1431_v61 = vld [vmem:[%s40_s13] sm:$0xff] }
  0x91   : > { %734 = vmatmul.f32.gmra.mxu1 %v1141_v36  ;;  %v774_v18 = vperm.slane %v1431_v61, 0 }
  0x92   : > { %442 = vmatmul.f32.gmra.mxu2 %v229_v17 }
  0x93   : > { %554 = vmatmul.f32.gmra.mxu3 %v238_v47 }
  0x95   : > { %v1344_v38 = vpop.f32.mrf.mxu0 }
  0x96   : > { %v356_v34 = vpop.f32.mrf.mxu3  ;;  %v1346_v39 = vpop.f32.mrf.mxu1  ;;  %v325_v5 = vadd.f32 %v1339_v29, %v1344_v38  ;;  %v1445_v38 = vperm.slane %v1106_v3, 0 }
  0x98   : > { %652 = vmatmul.f32.gmra.mxu0 %v1141_v36 }
  0x99   : > { %738 = vmatmul.f32.gmra.mxu1 %v1143_v37 }
  0x9a   : > { %447 = vmatmul.f32.gmra.mxu2 %v1154_v41 }
  0x9b   : > { %560 = vmatmul.f32.gmra.mxu3 %v246_v52 }
  0x9d   : > { %v242_v43 = vpop.f32.mrf.mxu2  ;;  %v1355_v59 = vpop.f32.mrf.mxu0 }
  0x9e   : > { %v360_v49 = vpop.f32.mrf.mxu3  ;;  %v1353_v50 = vadd.f32 %v356_v34, %v242_v43  ;;  %v1357_v47 = vpop.f32.mrf.mxu1  ;;  %v329_v30 = vadd.f32 %v1346_v39, %v1355_v59 }
  0xa0   : > { %656 = vmatmul.f32.gmra.mxu0 %v1143_v37 }
  0xa1   : > { %742 = vmatmul.f32.gmra.mxu1 %v1175_v54 }
  0xa2   : > { %452 = vmatmul.f32.gmra.mxu2 %v1158_v42 }
  0xa3   : > { %566 = vmatmul.f32.gmra.mxu3 %v254_v14 }
  0xa5   : > { %v250_v36 = vpop.f32.mrf.mxu2  ;;  %v1366_v9 = vpop.f32.mrf.mxu0 }
  0xa6   : > { %v364_v41 = vpop.f32.mrf.mxu3  ;;  %v1364_v52 = vadd.f32 %v360_v49, %v250_v36  ;;  %v1368_v12 = vpop.f32.mrf.mxu1  ;;  %v1450_v36 = vld [vmem:[%s1544_s3 + $0x8] sm:$0xff] }
  0xa7   : > { %v791_v39 = vadd.f32 %v774_v18, %v1450_v36 }
  0xa8   : > { %660 = vmatmul.f32.gmra.mxu0 %v1175_v54 }
  0xa9   : > { %746 = vmatmul.f32.gmra.mxu1 %v1200_v15 }
  0xaa   : > { %457 = vmatmul.f32.gmra.mxu2 %v1190_v62 }
  0xab   : > { %572 = vmatmul.f32.gmra.mxu3 %v262_v44 }
  0xad   : > { %v258_v37 = vpop.f32.mrf.mxu2  ;;  %v1377_v19 = vpop.f32.mrf.mxu0 }
  0xae   : > { %v368_v42 = vpop.f32.mrf.mxu3  ;;  %v1375_v14 = vadd.f32 %v364_v41, %v258_v37  ;;  %v1379_v31 = vpop.f32.mrf.mxu1 }
  0xb0   : > { %664 = vmatmul.f32.gmra.mxu0 %v1200_v15 }
  0xb1   : > { %750 = vmatmul.f32.gmra.mxu1 %v1227_v45 }
  0xb2   : > { %462 = vmatmul.f32.gmra.mxu2 %v1217_v24 }
  0xb3   : > { %578 = vmatmul.f32.gmra.mxu3 %v270_v8 }
  0xb5   : > { %v266_v54 = vpop.f32.mrf.mxu2  ;;  %v1388_v44 = vpop.f32.mrf.mxu0 }
  0xb6   : > { %v372_v62 = vpop.f32.mrf.mxu3  ;;  %v1386_v32 = vadd.f32 %v368_v42, %v266_v54  ;;  %v1390_v7 = vpop.f32.mrf.mxu1  ;;  %v767_v54 = vrot.slane %v1431_v61, 1 }
  0xb8   : > { %668 = vmatmul.f32.gmra.mxu0 %v1227_v45 }
  0xb9   : > { %754 = vmatmul.f32.gmra.mxu1 %v1251_v10 }
  0xba   : > { %467 = vmatmul.f32.gmra.mxu2 %v1243_v57 }
  0xbb   : > { %584 = vmatmul.f32.gmra.mxu3 %v278_v33 }
  0xbd   : > { %v274_v15 = vpop.f32.mrf.mxu2  ;;  %v1399_v4 = vpop.f32.mrf.mxu0 }
  0xbe   : > { %v376_v24 = vpop.f32.mrf.mxu3  ;;  %v1397_v63 = vadd.f32 %v372_v62, %v274_v15  ;;  %v1401_v8 = vpop.f32.mrf.mxu1  ;;  %v333_v62 = vadd.f32 %v1357_v47, %v1366_v9 }
  0xc0   : > { %672 = vmatmul.f32.gmra.mxu0 %v1251_v10 }
  0xc1   : > { %758 = vmatmul.f32.gmra.mxu1 %v1275_v35 }
  0xc2   : > { %472 = vmatmul.f32.gmra.mxu2 %v1267_v21 }
  0xc3   : > { %590 = vmatmul.f32.gmra.mxu3 %v286_v6 }
  0xc5   : > { %v282_v45 = vpop.f32.mrf.mxu2  ;;  %v1410_v26 = vpop.f32.mrf.mxu0 }
  0xc6   : > { %v380_v57 = vpop.f32.mrf.mxu3  ;;  %v1408_v16 = vadd.f32 %v376_v24, %v282_v45  ;;  %v1412_v27 = vpop.f32.mrf.mxu1 }
  0xc8   : > { %676 = vmatmul.f32.gmra.mxu0 %v1275_v35 }
  0xc9   : > { %762 = vmatmul.f32.gmra.mxu1 %v1292_v11 }
  0xca   : > { %477 = vmatmul.f32.gmra.mxu2 %v1288_v55 }
  0xcb   : > { %596 = vmatmul.f32.gmra.mxu3 %v294_v28  ;;  %v790_v28 = vadd.f32 %v774_v18, %v1439_v22 }
  0xcd   : > { %v290_v10 = vpop.f32.mrf.mxu2  ;;  %v1421_v48 = vpop.f32.mrf.mxu0 }
  0xce   : > { %v384_v21 = vpop.f32.mrf.mxu3  ;;  %v1419_v33 = vadd.f32 %v380_v57, %v290_v10  ;;  %v703_v53 = vpop.f32.mrf.mxu1 }
  0xd0   : > { %680 = vmatmul.f32.gmra.mxu0 %v1292_v11 }
  0xd2   : > { %482 = vmatmul.f32.gmra.mxu2 %v1300_v20 }
  0xd5   : > { %v298_v35 = vpop.f32.mrf.mxu2  ;;  %v621_v60 = vpop.f32.mrf.mxu0 }
  0xd6   : > { %v507_v56 = vpop.f32.mrf.mxu3  ;;  %v1425_v58 = vadd.f32 %v384_v21, %v298_v35  ;;  %v707_v55 = vpop.f32.mrf.mxu1 }
  0xdd   : > { %v408_v6 = vpop.f32.mrf.mxu2  ;;  %v625_v17 = vpop.f32.mrf.mxu0 }
  0xde   : > { %v513_v13 = vpop.f32.mrf.mxu3  ;;  %v409_v11 = vadd.f32 %v408_v6, %v325_v5  ;;  %v711_v20 = vpop.f32.mrf.mxu1 }
  0xe0   : > { %v508_v23 = vadd.f32 %v507_v56, %v409_v11  ;;  %v337_v11 = vadd.f32 %v1368_v12, %v1377_v19  ;;  %v341_v12 = vadd.f32 %v1379_v31, %v1388_v44 }
  0xe2   : > { %v622_v25 = vadd.f32 %v621_v60, %v508_v23 }
  0xe4   : > { %v704_v40 = vadd.f32 %v703_v53, %v622_v25  ;;  %v775_v53 = vperm.slane %v767_v54, 0 }
  0xe5   : > { %v413_v46 = vpop.f32.mrf.mxu2  ;;  %v629_v43 = vpop.f32.mrf.mxu0 }
  0xe6   : > { %v519_v51 = vpop.f32.mrf.mxu3  ;;  %v414_v29 = vadd.f32 %v413_v46, %v329_v30  ;;  %v806_v34 = vadd.f32 %v790_v28, %v704_v40  ;;  %v715_v49 = vpop.f32.mrf.mxu1  ;;  %v793_v46 = vadd.f32 %v775_v53, %v1450_v36 }
  0xe8   : > { %v514_v41 = vadd.f32 %v513_v13, %v414_v29  ;;  %v822_v37 = vmax.f32 %v806_v34, 0.0  ;;  %v792_v13 = vadd.f32 %v775_v53, %v1439_v22  ;;  %v768_v29 = vrot.slane %v1431_v61, 2 }
  0xea   : > { %v626_v42 = vadd.f32 %v625_v17, %v514_v41  ;;  %v841_v59 = vmul.f32 %v1445_v38, %v822_v37 }
  0xec   : > { %v708_v15 = vadd.f32 %v707_v55, %v626_v42  ;;  %857 = vadd.xlane.f32.xlu0 %v841_v59  ;;  %v776_v42 = vperm.slane %v768_v29, 0  ;;  %v353_v29 = vadd.f32 %v1412_v27, %v1421_v48 }
  0xed   : > { %v418_v24 = vpop.f32.mrf.mxu2  ;;  %v633_v21 = vpop.f32.mrf.mxu0 }
  0xee   : > { %v525_v45 = vpop.f32.mrf.mxu3  ;;  %v807_v57 = vadd.f32 %v791_v39, %v708_v15  ;;  %v419_v10 = vadd.f32 %v418_v24, %v333_v62  ;;  %v719_v35 = vpop.f32.mrf.mxu1  ;;  %v794_v24 = vadd.f32 %v776_v42, %v1439_v22 }
  0xf0   : > { %v823_v56 = vmax.f32 %v807_v57, 0.0  ;;  %v520_v60 = vadd.f32 %v519_v51, %v419_v10 }
  0xf2   : > { %v630_v5 = vadd.f32 %v629_v43, %v520_v60  ;;  %v842_v6 = vmul.f32 %v1445_v38, %v823_v56 }
  0xf4   : > { %v712_v47 = vadd.f32 %v711_v20, %v630_v5  ;;  %859 = vadd.xlane.f32.xlu0 %v842_v6  ;;  %v795_v6 = vadd.f32 %v776_v42, %v1450_v36 }
  0xf5   : > { %v423_v9 = vpop.f32.mrf.mxu2  ;;  %v637_v23 = vpop.f32.mrf.mxu0 }
  0xf6   : > { %v531_v55 = vpop.f32.mrf.mxu3  ;;  %v424_v17 = vadd.f32 %v423_v9, %v337_v11  ;;  %v808_v18 = vadd.f32 %v792_v13, %v712_v47  ;;  %v723_v25 = vpop.f32.mrf.mxu1  ;;  %v769_v11 = vrot.slane %v1431_v61, 3 }
  0xf8   : > { %v526_v28 = vadd.f32 %v525_v45, %v424_v17  ;;  %v824_v30 = vmax.f32 %v808_v18, 0.0  ;;  %v345_v45 = vadd.f32 %v1390_v7, %v1399_v4  ;;  %v349_v7 = vadd.f32 %v1401_v8, %v1410_v26 }
  0xf9   : > { %v777_v17 = vperm.slane %v769_v11, 0 }
  0xfa   : > { %v634_v40 = vadd.f32 %v633_v21, %v526_v28  ;;  %v843_v51 = vmul.f32 %v1445_v38, %v824_v30 }
  0xfc   : > { %v716_v19 = vadd.f32 %v715_v49, %v634_v40  ;;  %861 = vadd.xlane.f32.xlu1 %v843_v51  ;;  %v796_v40 = vadd.f32 %v777_v17, %v1439_v22 }
  0xfd   : > { %v428_v20 = vpop.f32.mrf.mxu2  ;;  %v641_v37 = vpop.f32.mrf.mxu0 }
  0xfe   : > { %v537_v34 = vpop.f32.mrf.mxu3  ;;  %v809_v43 = vadd.f32 %v793_v46, %v716_v19  ;;  %v429_v41 = vadd.f32 %v428_v20, %v341_v12  ;;  %v727_v39 = vpop.f32.mrf.mxu1 }
 0x100   : > { %v825_v59 = vmax.f32 %v809_v43, 0.0  ;;  %v532_v54 = vadd.f32 %v531_v55, %v429_v41 }
 0x102   : > { %v638_v62 = vadd.f32 %v637_v23, %v532_v54  ;;  %v844_v15 = vmul.f32 %v1445_v38, %v825_v59  ;;  %v770_v59 = vrot.slane %v1431_v61, 4 }
 0x104   : > { %v720_v31 = vadd.f32 %v719_v35, %v638_v62  ;;  %863 = vadd.xlane.f32.xlu1 %v844_v15 }
 0x105   : > { %v433_v44 = vpop.f32.mrf.mxu2  ;;  %v645_v21 = vpop.f32.mrf.mxu0 }
 0x106   : > { %v543_v49 = vpop.f32.mrf.mxu3  ;;  %v434_v57 = vadd.f32 %v433_v44, %v345_v45  ;;  %v810_v10 = vadd.f32 %v794_v24, %v720_v31  ;;  %v731_v60 = vpop.f32.mrf.mxu1  ;;  %v778_v24 = vperm.slane %v770_v59, 0  ;;  %v772_v59 = vrot.slane %v1431_v61, 6 }
 0x108   : > { %v538_v53 = vadd.f32 %v537_v34, %v434_v57  ;;  %v826_v56 = vmax.f32 %v810_v10, 0.0  ;;  %v798_v57 = vadd.f32 %v778_v24, %v1439_v22 }
 0x10a   : > { %v642_v5 = vadd.f32 %v641_v37, %v538_v53  ;;  %v845_v13 = vmul.f32 %v1445_v38, %v826_v56  ;;  %v797_v37 = vadd.f32 %v777_v17, %v1450_v36 }
 0x10c   : > { %v724_v4 = vadd.f32 %v723_v25, %v642_v5  ;;  %865 = vadd.xlane.f32.xlu2 %v845_v13 }
 0x10d   : > { %v438_v35 = vpop.f32.mrf.mxu2  ;;  %v649_v18 = vpop.f32.mrf.mxu0 }
 0x10e   : > { %v549_v47 = vpop.f32.mrf.mxu3  ;;  %v811_v9 = vadd.f32 %v795_v6, %v724_v4  ;;  %v439_v55 = vadd.f32 %v438_v35, %v349_v7  ;;  %v735_v51 = vpop.f32.mrf.mxu1  ;;  %v799_v4 = vadd.f32 %v778_v24, %v1450_v36 }
 0x110   : > { %v827_v23 = vmax.f32 %v811_v9, 0.0  ;;  %v544_v28 = vadd.f32 %v543_v49, %v439_v55 }
 0x112   : > { %v646_v30 = vadd.f32 %v645_v21, %v544_v28  ;;  %v846_v46 = vmul.f32 %v1445_v38, %v827_v23 }
 0x114   : > { %v728_v8 = vadd.f32 %v727_v39, %v646_v30  ;;  %867 = vadd.xlane.f32.xlu2 %v846_v46 }
 0x115   : > { %v443_v26 = vpop.f32.mrf.mxu2  ;;  %v653_v20 = vpop.f32.mrf.mxu0 }
 0x116   : > { %v555_v25 = vpop.f32.mrf.mxu3  ;;  %v812_v12 = vadd.f32 %v796_v40, %v728_v8  ;;  %v444_v19 = vadd.f32 %v443_v26, %v353_v29  ;;  %v739_v62 = vpop.f32.mrf.mxu1 }
 0x118   : > { %v828_v34 = vmax.f32 %v812_v12, 0.0  ;;  %v550_v43 = vadd.f32 %v549_v47, %v444_v19  ;;  %v771_v47 = vrot.slane %v1431_v61, 5 }
 0x11a   : > { %v650_v41 = vadd.f32 %v649_v18, %v550_v43  ;;  %v847_v42 = vmul.f32 %v1445_v38, %v828_v34  ;;  %v779_v28 = vperm.slane %v771_v47, 0 }
 0x11c   : > { %v732_v54 = vadd.f32 %v731_v60, %v650_v41  ;;  %869 = vadd.xlane.f32.xlu0 %v847_v42  ;;  %v800_v29 = vadd.f32 %v779_v28, %v1439_v22 }
 0x11d   : > { %v448_v27 = vpop.f32.mrf.mxu2  ;;  %v657_v45 = vpop.f32.mrf.mxu0 }
 0x11e   : > { %v561_v48 = vpop.f32.mrf.mxu3  ;;  %v813_v39 = vadd.f32 %v797_v37, %v732_v54  ;;  %v449_v15 = vadd.f32 %v448_v27, %v1353_v50  ;;  %v743_v13 = vpop.f32.mrf.mxu1  ;;  %v801_v37 = vadd.f32 %v779_v28, %v1450_v36 }
 0x120   : > { %v829_v31 = vmax.f32 %v813_v39, 0.0  ;;  %v556_v44 = vadd.f32 %v555_v25, %v449_v15  ;;  %v780_v15 = vperm.slane %v772_v59, 0 }
 0x122   : > { %v654_v49 = vadd.f32 %v653_v20, %v556_v44  ;;  %v848_v10 = vmul.f32 %v1445_v38, %v829_v31  ;;  %v802_v44 = vadd.f32 %v780_v15, %v1439_v22 }
 0x124   : > { %v736_v21 = vadd.f32 %v735_v51, %v654_v49  ;;  %871 = vadd.xlane.f32.xlu1 %v848_v10 }
 0x125   : > { %v453_v53 = vpop.f32.mrf.mxu2  ;;  %v661_v6 = vpop.f32.mrf.mxu0 }
 0x126   : > { %v567_v56 = vpop.f32.mrf.mxu3  ;;  %v814_v60 = vadd.f32 %v798_v57, %v736_v21  ;;  %v454_v5 = vadd.f32 %v453_v53, %v1364_v52  ;;  %v747_v46 = vpop.f32.mrf.mxu1 }
 0x128   : > { %v830_v11 = vmax.f32 %v814_v60, 0.0  ;;  %v562_v50 = vadd.f32 %v561_v48, %v454_v5 }
 0x12a   : > { %v658_v7 = vadd.f32 %v657_v45, %v562_v50  ;;  %v849_v35 = vmul.f32 %v1445_v38, %v830_v11  ;;  %v773_v50 = vrot.slane %v1431_v61, 7 }
 0x12c   : > { %v740_v9 = vadd.f32 %v739_v62, %v658_v7  ;;  %873 = vadd.xlane.f32.xlu2 %v849_v35 }
 0x12d   : > { %v458_v55 = vpop.f32.mrf.mxu2  ;;  %v665_v52 = vpop.f32.mrf.mxu0 }
 0x12e   : > { %v573_v17 = vpop.f32.mrf.mxu3  ;;  %v815_v18 = vadd.f32 %v799_v4, %v740_v9  ;;  %v459_v23 = vadd.f32 %v458_v55, %v1375_v14  ;;  %v751_v54 = vpop.f32.mrf.mxu1 }
 0x130   : > { %v831_v30 = vmax.f32 %v815_v18, 0.0  ;;  %v568_v40 = vadd.f32 %v567_v56, %v459_v23 }
 0x132   : > { %v662_v51 = vadd.f32 %v661_v6, %v568_v40  ;;  %v850_v8 = vmul.f32 %v1445_v38, %v831_v30 }
 0x134   : > { %v744_v26 = vadd.f32 %v743_v13, %v662_v51  ;;  %875 = vadd.xlane.f32.xlu0 %v850_v8  ;;  %v803_v13 = vadd.f32 %v780_v15, %v1450_v36 }
 0x135   : > { %v463_v25 = vpop.f32.mrf.mxu2  ;;  %v669_v14 = vpop.f32.mrf.mxu0 }
 0x136   : > { %v816_v12 = vadd.f32 %v800_v29, %v744_v26  ;;  %v464_v19 = vadd.f32 %v463_v25, %v1386_v32  ;;  %v579_v20 = vpop.f32.mrf.mxu3  ;;  %v755_v53 = vpop.f32.mrf.mxu1 }
 0x138   : > { %v832_v34 = vmax.f32 %v816_v12, 0.0  ;;  %v574_v43 = vadd.f32 %v573_v17, %v464_v19  ;;  %v781_v17 = vperm.slane %v773_v50, 0 }
 0x13a   : > { %v666_v41 = vadd.f32 %v665_v52, %v574_v43  ;;  %v851_v42 = vmul.f32 %v1445_v38, %v832_v34  ;;  %v804_v52 = vadd.f32 %v781_v17, %v1439_v22  ;;  %v805_v19 = vadd.f32 %v781_v17, %v1450_v36 }
 0x13b   : > { %v922_v36 = vlaneseq }
 0x13c   : > { %v748_v62 = vadd.f32 %v747_v46, %v666_v41  ;;  %877 = vadd.xlane.f32.xlu1 %v851_v42 }
 0x13d   : > { %v468_v27 = vpop.f32.mrf.mxu2  ;;  %v673_v57 = vpop.f32.mrf.mxu0 }
 0x13e   : > { %v817_v48 = vadd.f32 %v801_v37, %v748_v62  ;;  %v469_v39 = vadd.f32 %v468_v27, %v1397_v63  ;;  %v585_v45 = vpop.f32.mrf.mxu3  ;;  %v759_v18 = vpop.f32.mrf.mxu1 }
 0x140   : > { %v833_v32 = vmax.f32 %v817_v48, 0.0  ;;  %v580_v24 = vadd.f32 %v579_v20, %v469_v39 }
 0x142   : > { %v670_v31 = vadd.f32 %v669_v14, %v580_v24  ;;  %v852_v49 = vmul.f32 %v1445_v38, %v833_v32  ;;  %v889_v32 = vstv %s1547_s6  ;;  %v1513_v24 = vand.u32 127, %v922_v36 }
 0x144   : > { %v752_v10 = vadd.f32 %v751_v54, %v670_v31  ;;  %879 = vadd.xlane.f32.xlu2 %v852_v49  ;;  %v925_v31 = vadd.s32 4294967288, %v1513_v24 }
 0x145   : > { %v473_v21 = vpop.f32.mrf.mxu2  ;;  %v677_v47 = vpop.f32.mrf.mxu0 }
 0x146   : > { %v818_v56 = vadd.f32 %v802_v44, %v752_v10  ;;  %v474_v60 = vadd.f32 %v473_v21, %v1408_v16  ;;  %v591_v7 = vpop.f32.mrf.mxu3 }
 0x148   : > { %v834_v5 = vmax.f32 %v818_v56, 0.0  ;;  %v586_v6 = vadd.f32 %v585_v45, %v474_v60 }
 0x14a   : > { %v674_v63 = vadd.f32 %v673_v57, %v586_v6  ;;  %v853_v11 = vmul.f32 %v1445_v38, %v834_v5 }
 0x14c   : > { %v756_v4 = vadd.f32 %v755_v53, %v674_v63  ;;  %881 = vadd.xlane.f32.xlu0 %v853_v11 }
 0x14d   : > { %v478_v35 = vpop.f32.mrf.mxu2  ;;  %v681_v8 = vpop.f32.mrf.mxu0 }
 0x14e   : > { %v819_v9 = vadd.f32 %v803_v13, %v756_v4  ;;  %v479_v55 = vadd.f32 %v478_v35, %v1419_v33  ;;  %v597_v46 = vpop.f32.mrf.mxu3  ;;  %v763_v33 = vpop.f32.mrf.mxu1 }
 0x150   : > { %v835_v16 = vmax.f32 %v819_v9, 0.0  ;;  %v592_v23 = vadd.f32 %v591_v7, %v479_v55 }
 0x152   : > { %v678_v28 = vadd.f32 %v677_v47, %v592_v23  ;;  %v854_v30 = vmul.f32 %v1445_v38, %v835_v16 }
 0x154   : > { %v760_v40 = vadd.f32 %v759_v18, %v678_v28  ;;  %883 = vadd.xlane.f32.xlu1 %v854_v30 }
 0x155   : > { %v483_v61 = vpop.f32.mrf.mxu2 }
 0x156   : > { %v820_v51 = vadd.f32 %v804_v52, %v760_v40  ;;  %v484_v29 = vadd.f32 %v483_v61, %v1425_v58 }
 0x158   : > { %v836_v26 = vmax.f32 %v820_v51, 0.0  ;;  %v598_v25 = vadd.f32 %v597_v46, %v484_v29 }
 0x15a   : > { %v682_v12 = vadd.f32 %v681_v8, %v598_v25  ;;  %v855_v20 = vmul.f32 %v1445_v38, %v836_v26 }
 0x15c   : > { %v764_v34 = vadd.f32 %v763_v33, %v682_v12  ;;  %885 = vadd.xlane.f32.xlu2 %v855_v20 }
 0x15e   : > { %v821_v22 = vadd.f32 %v805_v19, %v764_v34 }
 0x15f   : > { %v858_v37 = vpop.xlane.xlu0 %857 }
 0x160   : > { %v837_v43 = vmax.f32 %v821_v22, 0.0  ;;  %v890_v53 = vadd.f32 %v889_v32, %v858_v37 }
 0x162   : > { %v856_v14 = vmul.f32 %v1445_v38, %v837_v43  ;;  %v924_v55 = vperm.slane %v890_v53, %v1513_v24 }
 0x164   : > { %887 = vadd.xlane.f32.xlu0 %v856_v14 }
 0x167   : > { %v860_v59 = vpop.xlane.xlu0 %859 }
 0x168   : > { %v891_v44 = vadd.f32 %v889_v32, %v860_v59 }
 0x16a   : > { %v926_v11 = vperm.slane %v891_v44, %v925_v31 }
 0x16c   : > { %v928_v40 = vsel %vm927_vm2, %v926_v11, %v924_v55 }
 0x16f   : > { %v862_v41 = vpop.xlane.xlu1 %861 }
 0x170   : > { %v892_v57 = vadd.f32 %v889_v32, %v862_v41 }
 0x172   : > { %v929_v35 = vperm.slane %v892_v57, %v1513_v24 }
 0x177   : > { %v864_v58 = vpop.xlane.xlu1 %863 }
 0x178   : > { %v893_v45 = vadd.f32 %v889_v32, %v864_v58 }
 0x17a   : > { %v930_v6 = vperm.slane %v893_v45, %v925_v31 }
 0x17c   : > { %v931_v28 = vsel %vm927_vm2, %v930_v6, %v929_v35 }
 0x17d   : > { %v951_v25 = vsel %vm950_vm3, %v931_v28, %v928_v40 }
 0x17f   : > { %v866_v42 = vpop.xlane.xlu2 %865 }
 0x180   : > { %v894_v56 = vadd.f32 %v889_v32, %v866_v42 }
 0x182   : > { %v932_v17 = vperm.slane %v894_v56, %v1513_v24 }
 0x187   : > { %v868_v54 = vpop.xlane.xlu2 %867 }
 0x188   : > { %v895_v49 = vadd.f32 %v889_v32, %v868_v54 }
 0x18a   : > { %v933_v50 = vperm.slane %v895_v49, %v925_v31 }
 0x18c   : > { %v934_v61 = vsel %vm927_vm2, %v933_v50, %v932_v17 }
 0x18d   : > { %v953_v20 = vsel %vm952_vm4, %v934_v61, %v951_v25 }
 0x18f   : > { %v870_v27 = vpop.xlane.xlu0 %869 }
 0x190   : > { %v896_v63 = vadd.f32 %v889_v32, %v870_v27 }
 0x192   : > { %v935_v52 = vperm.slane %v896_v63, %v1513_v24 }
 0x197   : > { %v872_v62 = vpop.xlane.xlu1 %871 }
 0x198   : > { %v897_v10 = vadd.f32 %v889_v32, %v872_v62 }
 0x19a   : > { %v936_v47 = vperm.slane %v897_v10, %v925_v31 }
 0x19c   : > { %v937_v29 = vsel %vm927_vm2, %v936_v47, %v935_v52 }
 0x19d   : > { %v955_v43 = vsel %vm954_vm5, %v937_v29, %v953_v20 }
 0x19f   : > { %v874_v48 = vpop.xlane.xlu2 %873 }
 0x1a0   : > { %v898_v7 = vadd.f32 %v889_v32, %v874_v48 }
 0x1a2   : > { %v938_v46 = vperm.slane %v898_v7, %v1513_v24 }
 0x1a7   : > { %v876_v15 = vpop.xlane.xlu0 %875 }
 0x1a8   : > { %v899_v60 = vadd.f32 %v889_v32, %v876_v15 }
 0x1aa   : > { %v939_v18 = vperm.slane %v899_v60, %v925_v31 }
 0x1ac   : > { %v940_v33 = vsel %vm927_vm2, %v939_v18, %v938_v46 }
 0x1ad   : > { %v957_v41 = vsel %vm956_vm6, %v940_v33, %v955_v43 }
 0x1af   : > { %v878_v39 = vpop.xlane.xlu1 %877 }
 0x1b0   : > { %v900_v9 = vadd.f32 %v889_v32, %v878_v39 }
 0x1b2   : > { %v941_v8 = vperm.slane %v900_v9, %v1513_v24 }
 0x1b7   : > { %v880_v38 = vpop.xlane.xlu2 %879 }
 0x1b8   : > { %v901_v13 = vadd.f32 %v889_v32, %v880_v38 }
 0x1ba   : > { %v942_v30 = vperm.slane %v901_v13, %v925_v31 }
 0x1bc   : > { %v943_v34 = vsel %vm927_vm2, %v942_v30, %v941_v8 }
 0x1bd   : > { %v959_v58 = vsel %vm958_vm7, %v943_v34, %v957_v41 }
 0x1bf   : > { %v882_v5 = vpop.xlane.xlu0 %881 }
 0x1c0   : > { %v902_v16 = vadd.f32 %v889_v32, %v882_v5 }
 0x1c2   : > { %v944_v12 = vperm.slane %v902_v16, %v1513_v24 }
 0x1c7   : > { %v884_v21 = vpop.xlane.xlu1 %883 }
 0x1c8   : > { %v903_v4 = vadd.f32 %v889_v32, %v884_v21 }
 0x1ca   : > { %v945_v51 = vperm.slane %v903_v4, %v925_v31 }
 0x1cc   : > { %v946_v14 = vsel %vm927_vm2, %v945_v51, %v944_v12 }
 0x1cd   : > { %v961_v59 = vsel %vm960_vm8, %v946_v14, %v959_v58 }
 0x1cf   : > { %v886_v23 = vpop.xlane.xlu2 %885 }
 0x1d0   : > { %v904_v26 = vadd.f32 %v889_v32, %v886_v23 }
 0x1d2   : > { %v947_v37 = vperm.slane %v904_v26, %v1513_v24 }
 0x1d7   : > { %v888_v19 = vpop.xlane.xlu0 %887 }
 0x1d8   : > { %v905_v22 = vadd.f32 %v889_v32, %v888_v19 }
 0x1da   : > { %v948_v42 = vperm.slane %v905_v22, %v925_v31  ;;  %37 = sbr.rel (!%p35_p0) target bundleno = 4 (0x4), region = 58 }
 0x1dc   : > { %v949_v54 = vsel %vm927_vm2, %v948_v42, %v947_v37 }
 0x1dd   : > { %v963_v62 = vsel %vm962_vm9, %v949_v54, %v961_v59 }
 0x1de   : > { %967 = vst.msk [vmem:[%s965_s20] sm:$0xff] %vm966_vm10, %v963_v62 }
 0x1df   :  { %980 = dma.vmem_to_hbm [thread:$0]  %s973_s25, 256, %s975_s23, [#allocation4], %s1046_s26, %s1046_s26, %s1047_s27  }
 0x1e0   :  { %1039 = dma.done.wait [#allocation4], 256  }
 0x1e1   :  { %1040 = vsyncadd [#allocation4], 4294967040 }
 0x1e2   :  { %985 = vsyncpa [#allocation4], 1 }

</bundles_post_ra>
